<compile_context>
chip_gen: v6e
topology: v6e:2x2x1
jax: 0.10.0
libtpu: 0.0.40
codegen_flags: <defaults>
</compile_context>

<pallas_src>
import functools

import jax
import jax.numpy as jnp
from jax.experimental import pallas as pl
from jax.experimental.pallas import tpu as pltpu


def _round_up(x, m):
    return ((x + m - 1) // m) * m


def _cdiv(a, b):
    return (a + b - 1) // b


# ---------------------------------------------------------------------------
# Kernel: ReLU(x @ W1 + b1) @ W2 + b2          (BN already folded into W1/b1)
# ---------------------------------------------------------------------------
def classifier_kernel(x_ref, w1_ref, b1_ref, w2_ref, b2_ref, out_ref):
    # x arrives either f32 (tiny-batch path: avoids a standalone wrapper cast)
    # or bf16 (large-batch path: halves the dominant x DMA stream). The MXU
    # operand is always bf16; accumulation, bias-add and ReLU stay in f32.
    x = x_ref[...].astype(jnp.bfloat16)                               # [tb, in_p]
    h = jnp.dot(x, w1_ref[...], preferred_element_type=jnp.float32)   # f32 [tb, mid_p]
    h = jnp.maximum(h + b1_ref[...], 0.0)
    h = h.astype(jnp.bfloat16)                                        # MXU operand only
    out = jnp.dot(h, w2_ref[...], preferred_element_type=jnp.float32) + b2_ref[...]
    out_ref[...] = out.astype(out_ref.dtype)                          # bf16 [tb, n_p]


# ---------------------------------------------------------------------------
# Batch tiling policy
# ---------------------------------------------------------------------------
def _choose_batch_tiling(B, tile_b):
    """Return (tile_rows, num_tiles) for the batch axis.

    * grid >= 2 when B >= 32 and >= 4 when B >= 128 so the "parallel" axis
      engages both TensorCores on v7x (costs ~nothing on single-TC v5e/v6e).
    * tiles capped at `tile_b` rows; tile rounded to 16 (bf16 sublane pack),
      so batch padding stays below ~16 rows per tile instead of up to a full
      tile (old `_round_up(B, tb)` behaviour).
    * B < 32: single tile, rounded to 8 (f32 sublane) — overhead-dominated.
    """
    if B < 32:
        return _round_up(B, 8), 1
    nt = _cdiv(B, tile_b)
    if B >= 128:
        nt = max(nt, 4)
    else:
        nt = max(nt, 2)
    tb = _round_up(_cdiv(B, nt), 16)
    return tb, nt


# ---------------------------------------------------------------------------
# Wrapper
# ---------------------------------------------------------------------------
def classifier_forward(x, params, n_class, *, tile_b=512, out_dtype=jnp.bfloat16):
    """x: [B, in_channel] (any float dtype). Returns [B, n_class] in `out_dtype`."""
    B = x.shape[0]
    in_p, mid_p = params["w1"].shape
    n_p = params["w2"].shape[1]

    small = B < 32
    if not small:
        # Large batch: kernel is HBM-bound on the x stream -> feed bf16.
        x = x.astype(jnp.bfloat16)
    # Tiny batch: keep x dtype as-is (skip a standalone cast round-trip); the
    # kernel casts to bf16 in-body.

    if x.shape[1] != in_p:
        x = jnp.pad(x, ((0, 0), (0, in_p - x.shape[1])))

    tb, nt = _choose_batch_tiling(B, tile_b)
    Bp = tb * nt
    if Bp != B:
        x = jnp.pad(x, ((0, Bp - B), (0, 0)))

    x_bytes = jnp.dtype(x.dtype).itemsize
    flops = 2 * Bp * (in_p * mid_p + mid_p * n_p)
    bytes_accessed = (
        Bp * in_p * x_bytes      # x stream
        + in_p * mid_p * 2       # w1 (bf16)
        + mid_p * n_p * 2        # w2 (bf16)
        + (mid_p + n_p) * 4      # biases (f32)
        + Bp * n_p * 2           # out (bf16)
    )

    out = pl.pallas_call(
        classifier_kernel,
        out_shape=jax.ShapeDtypeStruct((Bp, n_p), jnp.bfloat16),
        grid=(nt,),
        in_specs=[
            pl.BlockSpec((tb, in_p), lambda i: (i, 0)),      # x: tiled over batch
            pl.BlockSpec((in_p, mid_p), lambda i: (0, 0)),   # w1: resident
            pl.BlockSpec((1, mid_p), lambda i: (0, 0)),      # b1: resident
            pl.BlockSpec((mid_p, n_p), lambda i: (0, 0)),    # w2: resident
            pl.BlockSpec((1, n_p), lambda i: (0, 0)),        # b2: resident
        ],
        out_specs=pl.BlockSpec((tb, n_p), lambda i: (i, 0)),
        compiler_params=pltpu.CompilerParams(
            dimension_semantics=("parallel",),
        ),
        cost_estimate=pl.CostEstimate(
            flops=flops, transcendentals=0, bytes_accessed=bytes_accessed
        ),
    )(x, params["w1"], params["b1"], params["w2"], params["b2"])

    out = out[:B, :n_class]
    if out_dtype != jnp.bfloat16:
        out = out.astype(out_dtype)
    return out


# ---------------------------------------------------------------------------
# Parameter construction: raw PyTorch-style params, BN fold + pad + bf16 cast
# ---------------------------------------------------------------------------
def init_raw_params(key, in_channel, mid_channel, n_class):
    """Deterministic kaiming-style init with non-trivial BN running stats."""
    ks = jax.random.split(key, 10)
    f32 = jnp.float32
    raw = dict(
        # BatchNorm1d(in_channel)
        gamma1=1.0 + 0.02 * jax.random.normal(ks[0], (in_channel,), f32),
        beta1=0.01 * jax.random.normal(ks[1], (in_channel,), f32),
        mean1=0.05 * jax.random.normal(ks[2], (in_channel,), f32),
        var1=1.0 + 0.1 * jax.random.uniform(ks[3], (in_channel,), f32),
        # Linear(in_channel, mid_channel) — stored pre-transposed as [in, out]
        w1=jax.random.normal(ks[4], (in_channel, mid_channel), f32)
        * jnp.sqrt(2.0 / in_channel),
        b1=jnp.zeros((mid_channel,), f32),
        # BatchNorm1d(mid_channel)
        gamma2=1.0 + 0.02 * jax.random.normal(ks[5], (mid_channel,), f32),
        beta2=0.01 * jax.random.normal(ks[6], (mid_channel,), f32),
        mean2=0.05 * jax.random.normal(ks[7], (mid_channel,), f32),
        var2=1.0 + 0.1 * jax.random.uniform(ks[8], (mid_channel,), f32),
        # Linear(mid_channel, n_class)
        w2=jax.random.normal(ks[9], (mid_channel, n_class), f32)
        * jnp.sqrt(2.0 / mid_channel),
        b2=jnp.zeros((n_class,), f32),
    )
    return raw


def prepare_params(raw, eps=1e-5):
    """Fold BN1/BN2 into Linear1, pad all feature dims to multiples of 128
    (lane-dense), cast matmul operands to bf16 (biases stay f32)."""
    bn1_scale = raw["gamma1"] / jnp.sqrt(raw["var1"] + eps)
    bn1_shift = raw["beta1"] - raw["mean1"] * bn1_scale
    bn2_scale = raw["gamma2"] / jnp.sqrt(raw["var2"] + eps)
    bn2_shift = raw["beta2"] - raw["mean2"] * bn2_scale

    # Fold: BN2(ReLU-pre)(BN1(x) @ W1 + b1)  ==  x @ W1' + b1'   (pre-ReLU affine)
    w1f = (bn1_scale[:, None] * raw["w1"]) * bn2_scale[None, :]
    b1f = (bn1_shift @ raw["w1"] + raw["b1"]) * bn2_scale + bn2_shift
    w2 = raw["w2"]
    b2 = raw["b2"]

    in_ch, mid = w1f.shape
    n_class = w2.shape[1]
    in_p = _round_up(in_ch, 128)
    mid_p = _round_up(mid, 128)
    n_p = _round_up(n_class, 128)   # lane-dense output stores

    w1f = jnp.pad(w1f, ((0, in_p - in_ch), (0, mid_p - mid)))
    b1f = jnp.pad(b1f, (0, mid_p - mid))
    w2 = jnp.pad(w2, ((0, mid_p - mid), (0, n_p - n_class)))
    b2 = jnp.pad(b2, (0, n_p - n_class))

    return dict(
        w1=w1f.astype(jnp.bfloat16),
        b1=b1f.reshape(1, mid_p).astype(jnp.float32),
        w2=w2.astype(jnp.bfloat16),
        b2=b2.reshape(1, n_p).astype(jnp.float32),
    )


# ---------------------------------------------------------------------------
# References
# ---------------------------------------------------------------------------
def reference_forward_mirrored(x, params, n_class):
    """Pure-JAX reference with the exact same (folded, bf16) arithmetic."""
    in_p = params["w1"].shape[0]
    xb = x.astype(jnp.bfloat16)
    if xb.shape[1] != in_p:
        xb = jnp.pad(xb, ((0, 0), (0, in_p - xb.shape[1])))
    h = jnp.dot(xb, params["w1"], preferred_element_type=jnp.float32) + params["b1"]
    h = jnp.maximum(h, 0.0).astype(jnp.bfloat16)
    out = jnp.dot(h, params["w2"], preferred_element_type=jnp.float32) + params["b2"]
    return out[:, :n_class].astype(jnp.bfloat16)


def reference_forward_f32(x, raw, eps=1e-5):
    """Full-precision eval-mode reference of the original module (unfused)."""
    s1 = raw["gamma1"] / jnp.sqrt(raw["var1"] + eps)
    h = (x - raw["mean1"]) * s1 + raw["beta1"]
    h = h @ raw["w1"] + raw["b1"]
    s2 = raw["gamma2"] / jnp.sqrt(raw["var2"] + eps)
    h = (h - raw["mean2"]) * s2 + raw["beta2"]
    h = jnp.maximum(h, 0.0)
    return h @ raw["w2"] + raw["b2"]


# ---------------------------------------------------------------------------
if __name__ == "__main__":
    # BatchNorm1d(512) in layer2 pins in_channel = 512.
    IN_CH, MID_CH, N_CLASS = 512, 128, 10

    key = jax.random.PRNGKey(0)
    kx_small, kx_multi, kp = jax.random.split(key, 3)

    raw = init_raw_params(kp, IN_CH, MID_CH, N_CLASS)
    params = prepare_params(raw)

    fwd = jax.jit(functools.partial(classifier_forward, n_class=N_CLASS))

    # B=8  -> tiny path (grid=1, f32 x fed directly, no wrapper pad/cast).
    # B=40 -> multi-tile path (grid=2, bf16 x, batch padded 40 -> 64).
    for B, kx in ((8, kx_small), (40, kx_multi)):
        x = jax.random.normal(kx, (B, IN_CH), jnp.float32)
        pred = jax.block_until_ready(fwd(x, params))
        assert pred.shape == (B, N_CLASS)
        assert pred.dtype == jnp.bfloat16

        # Tight check vs a reference with identical (folded, bf16) arithmetic.
        ref_mirror = reference_forward_mirrored(x, params, N_CLASS)
        assert jnp.allclose(
            pred.astype(jnp.float32), ref_mirror.astype(jnp.float32),
            atol=2e-2, rtol=2e-2,
        ), f"B={B}: mismatch vs bf16-mirrored JAX reference"

        # Loose check vs the full-precision, unfused original module math.
        ref_f32 = reference_forward_f32(x, raw)
        assert jnp.allclose(
            pred.astype(jnp.float32), ref_f32, atol=2e-1, rtol=2e-1
        ), f"B={B}: mismatch vs f32 module reference"

    print("KERNEL_OK")
</pallas_src>

<mosaic_0001>
module attributes {stable_mosaic.version = 11 : i64} {
  func.func @classifier_kernel(%arg0: i32, %arg1: memref<8x512xf32, #tpu.memory_space<vmem>>, %arg2: memref<512x128xbf16, #tpu.memory_space<vmem>>, %arg3: memref<1x128xf32, #tpu.memory_space<vmem>>, %arg4: memref<128x128xbf16, #tpu.memory_space<vmem>>, %arg5: memref<1x128xf32, #tpu.memory_space<vmem>>, %arg6: memref<8x128xbf16, #tpu.memory_space<vmem>>) attributes {dimension_semantics = [#tpu.dimension_semantics<parallel>], iteration_bounds = array<i64: 1>, scalar_prefetch = 0 : i64, scratch_operands = 0 : i64, tpu.core_type = #tpu.core_type<tc>, window_params = [{transform_indices = @transform_0, window_bounds = array<i64: 8, 512>}, {pipeline_mode = #tpu.pipeline_mode<synchronous>, transform_indices = @transform_1, window_bounds = array<i64: 512, 128>}, {pipeline_mode = #tpu.pipeline_mode<synchronous>, transform_indices = @transform_2, window_bounds = array<i64: 1, 128>}, {pipeline_mode = #tpu.pipeline_mode<synchronous>, transform_indices = @transform_3, window_bounds = array<i64: 128, 128>}, {pipeline_mode = #tpu.pipeline_mode<synchronous>, transform_indices = @transform_4, window_bounds = array<i64: 1, 128>}, {transform_indices = @transform_5, window_bounds = array<i64: 8, 128>}]} {
    %c0 = arith.constant 0 : index
    %c0_0 = arith.constant 0 : index
    %0 = vector.load %arg1[%c0, %c0_0] : memref<8x512xf32, #tpu.memory_space<vmem>>, vector<8x512xf32>
    %1 = arith.truncf %0 : vector<8x512xf32> to vector<8x512xbf16>
    %c0_1 = arith.constant 0 : index
    %c0_2 = arith.constant 0 : index
    %2 = vector.load %arg2[%c0_1, %c0_2] : memref<512x128xbf16, #tpu.memory_space<vmem>>, vector<512x128xbf16>
    %cst = arith.constant dense<0.000000e+00> : vector<8x128xf32>
    %3 = tpu.matmul %1, %2, %cst {dimension_numbers = #tpu.dot_dimension_numbers<[1], [0], [0], [1], [0, 0, 1, 1], [], []>} : vector<8x512xbf16>, vector<512x128xbf16>, vector<8x128xf32> -> vector<8x128xf32>
    %c0_3 = arith.constant 0 : index
    %c0_4 = arith.constant 0 : index
    %4 = vector.load %arg3[%c0_3, %c0_4] : memref<1x128xf32, #tpu.memory_space<vmem>>, vector<1x128xf32>
    %5 = vector.broadcast %4 : vector<1x128xf32> to vector<8x128xf32>
    %6 = arith.addf %3, %5 : vector<8x128xf32>
    %cst_5 = arith.constant 0.000000e+00 : f32
    %7 = vector.broadcast %cst_5 : f32 to vector<8x128xf32>
    %8 = arith.maximumf %6, %7 : vector<8x128xf32>
    %9 = arith.truncf %8 : vector<8x128xf32> to vector<8x128xbf16>
    %c0_6 = arith.constant 0 : index
    %c0_7 = arith.constant 0 : index
    %10 = vector.load %arg4[%c0_6, %c0_7] : memref<128x128xbf16, #tpu.memory_space<vmem>>, vector<128x128xbf16>
    %cst_8 = arith.constant dense<0.000000e+00> : vector<8x128xf32>
    %11 = tpu.matmul %9, %10, %cst_8 {dimension_numbers = #tpu.dot_dimension_numbers<[1], [0], [0], [1], [0, 0, 1, 1], [], []>} : vector<8x128xbf16>, vector<128x128xbf16>, vector<8x128xf32> -> vector<8x128xf32>
    %c0_9 = arith.constant 0 : index
    %c0_10 = arith.constant 0 : index
    %12 = vector.load %arg5[%c0_9, %c0_10] : memref<1x128xf32, #tpu.memory_space<vmem>>, vector<1x128xf32>
    %13 = vector.broadcast %12 : vector<1x128xf32> to vector<8x128xf32>
    %14 = arith.addf %11, %13 : vector<8x128xf32>
    %15 = arith.truncf %14 : vector<8x128xf32> to vector<8x128xbf16>
    %c0_11 = arith.constant 0 : index
    %c0_12 = arith.constant 0 : index
    %16 = vector.load %arg6[%c0_11, %c0_12] : memref<8x128xbf16, #tpu.memory_space<vmem>>, vector<8x128xbf16>
    tpu.vector_store %arg6[%c0_11, %c0_12], %15 {strides = array<i32>} : memref<8x128xbf16, #tpu.memory_space<vmem>>, vector<8x128xbf16>,
    return
  }
  func.func @transform_0(%arg0: i32) -> (i32, i32) {
    %c0_i32 = arith.constant 0 : i32
    %c0_i32_0 = arith.constant 0 : i32
    return %arg0, %c0_i32 : i32, i32
  }
  func.func @transform_1(%arg0: i32) -> (i32, i32) {
    %c0_i32 = arith.constant 0 : i32
    %c0_i32_0 = arith.constant 0 : i32
    %c0_i32_1 = arith.constant 0 : i32
    return %c0_i32, %c0_i32_0 : i32, i32
  }
  func.func @transform_2(%arg0: i32) -> (i32, i32) {
    %c0_i32 = arith.constant 0 : i32
    %c0_i32_0 = arith.constant 0 : i32
    %c0_i32_1 = arith.constant 0 : i32
    return %c0_i32, %c0_i32_0 : i32, i32
  }
  func.func @transform_3(%arg0: i32) -> (i32, i32) {
    %c0_i32 = arith.constant 0 : i32
    %c0_i32_0 = arith.constant 0 : i32
    %c0_i32_1 = arith.constant 0 : i32
    return %c0_i32, %c0_i32_0 : i32, i32
  }
  func.func @transform_4(%arg0: i32) -> (i32, i32) {
    %c0_i32 = arith.constant 0 : i32
    %c0_i32_0 = arith.constant 0 : i32
    %c0_i32_1 = arith.constant 0 : i32
    return %c0_i32, %c0_i32_0 : i32, i32
  }
  func.func @transform_5(%arg0: i32) -> (i32, i32) {
    %c0_i32 = arith.constant 0 : i32
    %c0_i32_0 = arith.constant 0 : i32
    return %arg0, %c0_i32 : i32, i32
  }
}

</mosaic_0001>

<bundles_post_ra>
// kernel: classifier_forward.1
= control target key start
LH: loop header
LB: loop body
LE: loop exit
PB: predicated region body
PF: predicated region fallthrough
CT: control target
= control target key end

     0   :  { %10 = vsyncpa [#allocation3], 0  ;;  %s848_s0 = inlined_call_operand.hbm [shape: f32[8,512], index: 0, kind: input, shape index: {}]   ;;  %s849_s1 = inlined_call_operand.hbm [shape: bf16[512,128], index: 1, kind: input, shape index: {}]   ;;  %s850_s2 = inlined_call_operand.vmem [shape: f32[1,128], index: 2, kind: input, shape index: {}]   ;;  %s851_s3 = inlined_call_operand.hbm [shape: bf16[128,128], index: 3, kind: input, shape index: {}]   ;;  %s852_s4 = inlined_call_operand.vmem [shape: f32[1,128], index: 4, kind: input, shape index: {}]   ;;  %s853_s5 = inlined_call_operand.hbm [shape: bf16[8,128], index: 5, kind: output, shape index: {}]  }
   0x1   :  { %11 = vsyncpa [#allocation6], 0 }
   0x2   :  { %12 = vsyncpa [#allocation4], 0  ;;  %s792_s18 = smov [#allocation5]  }
   0x3   :  { %s28_s19 = sshll.u32 %s792_s18, 4  ;;  %s29_s19 = int_to_ptr.vmem [resolvable:$true] %s28_s19 }
   0x4   :  { %s714_s20 = scalar_lea.vmem %s29_s19, 4096  ;;  %p719_p1 = scmp.lt.s32.totalorder %s29_s19, %s29_s19 }
   0x5   :  { %p715_p0 = scmp.ne.s32.totalorder %s29_s19, %s714_s20  ;;  %p720_p2 = scmp.lt.s32.totalorder %s714_s20, %s714_s20 }
   0x7   :  { %p721_p3 = por %p720_p2, %p719_p1 }
   0x9   :  { %p722_p4 = pnand %p721_p3, %p715_p0 }
   0xb   :  { %725 = shalt.err (!%p722_p4)
}
   0xc   :  { %s793_s21 = smov 64   ;;  %s794_s22 = smov 4  }
   0xd   :  { %34 = dma.hbm_to_vmem [thread:$0]  %s849_s1, 4096, %s29_s19, [#allocation6], %s793_s21, %s793_s21, %s794_s22  }
   0xe   :  { %s795_s25 = smov [#allocation2]   ;;  %s796_s27 = smov [#allocation7]  }
   0xf   :  { %s19_s26 = sshll.u32 %s795_s25, 4  ;;  %s42_s28 = sshll.u32 %s796_s27, 4  ;;  %s20_s26 = int_to_ptr.vmem [resolvable:$true] %s19_s26  ;;  %s43_s28 = int_to_ptr.vmem [resolvable:$true] %s42_s28 }
  0x10   :  { %s734_s29 = scalar_lea.vmem %s20_s26, 512  ;;  %p739_p6 = scmp.lt.s32.totalorder %s20_s26, %s20_s26 }
  0x11   :  { %p735_p5 = scmp.ne.s32.totalorder %s20_s26, %s734_s29  ;;  %p740_p7 = scmp.lt.s32.totalorder %s734_s29, %s734_s29 }
  0x13   :  { %p741_p8 = por %p740_p7, %p739_p6 }
  0x15   :  { %p742_p9 = pnand %p741_p8, %p735_p5 }
  0x17   :  { %745 = shalt.err (!%p742_p9)
}
  0x18   :  { %22 = dma.hbm_to_vmem [thread:$0]  %s848_s0, 512, %s20_s26, [#allocation3]  }
  0x19   :  { %s754_s7 = scalar_lea.vmem %s43_s28, 1024  ;;  %p759_p11 = scmp.lt.s32.totalorder %s43_s28, %s43_s28 }
  0x1a   :  { %p755_p10 = scmp.ne.s32.totalorder %s43_s28, %s754_s7  ;;  %p760_p12 = scmp.lt.s32.totalorder %s754_s7, %s754_s7 }
  0x1c   :  { %p761_p13 = por %p760_p12, %p759_p11 }
  0x1e   :  { %p762_p0 = pnand %p761_p13, %p755_p10 }
  0x20   :  { %765 = shalt.err (!%p762_p0)
}
  0x21   :  { %48 = dma.hbm_to_vmem [thread:$0]  %s851_s3, 1024, %s43_s28, [#allocation6], %s793_s21, %s793_s21, %s794_s22  }
  0x22   :  { %786 = dma.done.wait [#allocation3], 512  }
  0x23   :  { %787 = vsyncadd [#allocation3], 4294966784 }
  0x24   :  { %788 = dma.done.wait [#allocation6], 5120  }
  0x25   :  { %789 = vsyncadd [#allocation6], 4294962176  ;;  %v666_v0 = vld [vmem:[#allocation5 + $0x78] sm:$0xff]   ;;  %v670_v4 = vld [vmem:[#allocation5 + $0x70] sm:$0xff]   ;;  %v797_v39 = vmov 0.0   ;;  %vm798_vm0 = vmmov 0  }
  0x26   :  { %v667_v1 = vld [vmem:[#allocation5 + $0xf8] sm:$0xff]   ;;  %585 = vmatprep.subr.bf16.mxu0 %v666_v0  ;;  %v671_v5 = vld [vmem:[#allocation5 + $0xf0] sm:$0xff]   ;;  %v674_v8 = vld [vmem:[#allocation5 + $0x68] sm:$0xff]   ;;  %s799_s11 = smov [#allocation8]  }
  0x27   :  { %v668_v2 = vld [vmem:[#allocation5 + $0x38] sm:$0xff]   ;;  %607 = vmatprep.subr.bf16.mxu1 %v667_v1  ;;  %v672_v6 = vld [vmem:[#allocation5 + $0x30] sm:$0xff]   ;;  %v675_v9 = vld [vmem:[#allocation5 + $0xe8] sm:$0xff]  }
  0x28   :  { %v669_v3 = vld [vmem:[#allocation5 + $0xb8] sm:$0xff]   ;;  %586 = vmatpush3.bf16.msra.mxu0 %v668_v2  ;;  %v673_v7 = vld [vmem:[#allocation5 + $0xb0] sm:$0xff]   ;;  %v676_v10 = vld [vmem:[#allocation5 + $0x28] sm:$0xff]  }
  0x29   :  { %608 = vmatpush3.bf16.msra.mxu1 %v669_v3  ;;  %587 = vmatprep.subr.bf16.mxu0 %v670_v4  ;;  %v677_v11 = vld [vmem:[#allocation5 + $0xa8] sm:$0xff]   ;;  %v678_v12 = vld [vmem:[#allocation5 + $0x60] sm:$0xff]   ;;  %v682_v16 = vld [vmem:[#allocation5 + $0x58] sm:$0xff]  }
  0x2a   :  { %609 = vmatprep.subr.bf16.mxu1 %v671_v5  ;;  %v679_v13 = vld [vmem:[#allocation5 + $0xe0] sm:$0xff]   ;;  %v683_v17 = vld [vmem:[#allocation5 + $0xd8] sm:$0xff]   ;;  %v686_v20 = vld [vmem:[#allocation5 + $0x50] sm:$0xff]  }
  0x2b   :  { %v680_v14 = vld [vmem:[#allocation5 + $0x20] sm:$0xff]   ;;  %v684_v18 = vld [vmem:[#allocation5 + $0x18] sm:$0xff]   ;;  %v687_v21 = vld [vmem:[#allocation5 + $0xd0] sm:$0xff]  }
  0x2c   :  { %588 = vmatpush3.bf16.msra.mxu0 %v672_v6  ;;  %v681_v15 = vld [vmem:[#allocation5 + $0xa0] sm:$0xff]   ;;  %v685_v19 = vld [vmem:[#allocation5 + $0x98] sm:$0xff]   ;;  %v688_v22 = vld [vmem:[#allocation5 + $0x10] sm:$0xff]  }
  0x2d   :  { %610 = vmatpush3.bf16.msra.mxu1 %v673_v7  ;;  %589 = vmatprep.subr.bf16.mxu0 %v674_v8  ;;  %v689_v23 = vld [vmem:[#allocation5 + $0x90] sm:$0xff]   ;;  %v690_v24 = vld [vmem:[#allocation5 + $0x48] sm:$0xff]   ;;  %v694_v28 = vld [vmem:[#allocation5 + $0x40] sm:$0xff]  }
  0x2e   :  { %611 = vmatprep.subr.bf16.mxu1 %v675_v9  ;;  %v691_v25 = vld [vmem:[#allocation5 + $0xc8] sm:$0xff]   ;;  %v695_v29 = vld [vmem:[#allocation5 + $0xc0] sm:$0xff]   ;;  %v64_v33 = vld [vmem:[#allocation2 + $0x18] sm:$0xff] }
  0x2f   :  { %v692_v26 = vld [vmem:[#allocation5 + $0x8] sm:$0xff]   ;;  %v696_v30 = vld [vmem:[#allocation5] sm:$0xff]   ;;  %v68_v36 = vpack.c.bf16 %v64_v33, %v64_v33  ;;  %v63_v38 = vld [vmem:[#allocation2 + $0x10] sm:$0xff] }
  0x30   :  { %590 = vmatpush3.bf16.msra.mxu0 %v676_v10  ;;  %v693_v27 = vld [vmem:[#allocation5 + $0x88] sm:$0xff]   ;;  %v697_v31 = vld [vmem:[#allocation5 + $0x80] sm:$0xff]   ;;  %v67_v40 = vpack.c.bf16 %v63_v38, %v63_v38  ;;  %v698_v41 = vld [vmem:[#allocation7 + $0x38] sm:$0xff]  }
  0x31   :  { %612 = vmatpush3.bf16.msra.mxu1 %v677_v11  ;;  %591 = vmatprep.subr.bf16.mxu0 %v678_v12  ;;  %v62_v32 = vld [vmem:[#allocation2 + $0x8] sm:$0xff]  ;;  %v61_v34 = vld [vmem:[#allocation2] sm:$0xff]  ;;  %v699_v42 = vld [vmem:[#allocation7 + $0x30] sm:$0xff]  }
  0x32   :  { %613 = vmatprep.subr.bf16.mxu1 %v679_v13  ;;  %v66_v35 = vpack.c.bf16 %v62_v32, %v62_v32  ;;  %v65_v37 = vpack.c.bf16 %v61_v34, %v61_v34  ;;  %404 = vmatprep.mubr.bf16.mxu1 %v68_v36  ;;  %v700_v43 = vld [vmem:[#allocation7 + $0x28] sm:$0xff]   ;;  %v701_v44 = vld [vmem:[#allocation7 + $0x20] sm:$0xff]   ;;  %v702_v45 = vld [vmem:[#allocation7 + $0x18] sm:$0xff]  }
  0x33   :  { %v703_v46 = vld [vmem:[#allocation7 + $0x10] sm:$0xff]   ;;  %v704_v47 = vld [vmem:[#allocation7 + $0x8] sm:$0xff]   ;;  %v705_v48 = vld [vmem:[#allocation7] sm:$0xff]  }
  0x34   :  { %592 = vmatpush3.bf16.msra.mxu0 %v680_v14  ;;  %364 = vmatprep.mubr.bf16.mxu0 %v66_v35  ;;  %v543_v51 = vld [vmem:[%s850_s2] ss:$0 sm:$0xff]  ;;  %s533_s2 = sshll.u32 %s799_s11, 4  ;;  %s534_s2 = int_to_ptr.vmem [resolvable:$true] %s533_s2 }
  0x35   :  { %614 = vmatpush3.bf16.msra.mxu1 %v681_v15  ;;  %593 = vmatprep.subr.bf16.mxu0 %v682_v16  ;;  %v576_v0 = vld [vmem:[%s852_s4] ss:$0 sm:$0xff]  ;;  %s766_s12 = scalar_lea.vmem %s534_s2, 64  ;;  %p771_p2 = scmp.lt.s32.totalorder %s534_s2, %s534_s2 }
  0x36   :  { %615 = vmatprep.subr.bf16.mxu1 %v683_v17  ;;  %p767_p1 = scmp.ne.s32.totalorder %s534_s2, %s766_s12  ;;  %p772_p3 = scmp.lt.s32.totalorder %s766_s12, %s766_s12 }
  0x38   :  { %594 = vmatpush3.bf16.msra.mxu0 %v684_v18  ;;  %p773_p4 = por %p772_p3, %p771_p2 }
  0x39   :  { %616 = vmatpush3.bf16.msra.mxu1 %v685_v19  ;;  %595 = vmatprep.subr.bf16.mxu0 %v686_v20 }
  0x3a   :  { %617 = vmatprep.subr.bf16.mxu1 %v687_v21  ;;  %p774_p5 = pnand %p773_p4, %p767_p1 }
  0x3c   :  { %596 = vmatpush3.bf16.msra.mxu0 %v688_v22 }
  0x3d   :  { %618 = vmatpush3.bf16.msra.mxu1 %v689_v23  ;;  %597 = vmatprep.subr.bf16.mxu0 %v690_v24 }
  0x3e   :  { %619 = vmatprep.subr.bf16.mxu1 %v691_v25 }
  0x40   :  { %598 = vmatpush3.bf16.msra.mxu0 %v692_v26 }
  0x41   :  { %620 = vmatpush3.bf16.msra.mxu1 %v693_v27  ;;  %599 = vmatprep.subr.bf16.mxu0 %v694_v28 }
  0x42   :  { %621 = vmatprep.subr.bf16.mxu1 %v695_v29 }
  0x44   :  { %600 = vmatpush3.bf16.msra.mxu0 %v696_v30 }
  0x45   :  { %622 = vmatpush3.bf16.msra.mxu1 %v697_v31  ;;  %638 = vmatprep.subr.bf16.mxu0 %v797_v39 }
  0x47   :  { %365 = vmatmul.mubr.bf16.vlgmr.msra.gmra.mxu0 %v65_v37 }
  0x48   :  { %405 = vmatmul.mubr.bf16.vlgmr.msra.gmra.mxu1 %v67_v40  ;;  %639 = vmatpush3.bf16.msra.mxu0 %v698_v41 }
  0x49   :  { %640 = vmatprep.subr.bf16.mxu0 %v797_v39  ;;  %654 = vmatprep.mubr.msk.bf16.mxu0 %vm798_vm0, %v797_v39 }
  0x4c   :  { %641 = vmatpush3.bf16.msra.mxu0 %v699_v42 }
  0x4d   :  { %642 = vmatprep.subr.bf16.mxu0 %v797_v39 }
  0x50   :  { %643 = vmatpush3.bf16.msra.mxu0 %v700_v43 }
  0x51   :  { %644 = vmatprep.subr.bf16.mxu0 %v797_v39 }
  0x54   :  { %645 = vmatpush3.bf16.msra.mxu0 %v701_v44 }
  0x55   :  { %646 = vmatprep.subr.bf16.mxu0 %v797_v39 }
  0x58   :  { %647 = vmatpush3.bf16.msra.mxu0 %v702_v45 }
  0x59   :  { %648 = vmatprep.subr.bf16.mxu0 %v797_v39 }
  0x5c   :  { %649 = vmatpush3.bf16.msra.mxu0 %v703_v46 }
  0x5d   :  { %650 = vmatprep.subr.bf16.mxu0 %v797_v39 }
  0x60   :  { %651 = vmatpush3.bf16.msra.mxu0 %v704_v47 }
  0x61   :  { %652 = vmatprep.subr.bf16.mxu0 %v797_v39 }
  0x64   :  { %653 = vmatpush3.bf16.msra.mxu0 %v705_v48 }
 0x107   :  { %v601_v49 = vpop.f32.mrf.mxu0 }
 0x108   :  { %v623_v50 = vpop.f32.mrf.mxu1 }
 0x109   :  { %v602_v52 = vpop.f32.mrf.mxu0 }
 0x10a   :  { %v624_v53 = vpop.f32.mrf.mxu1  ;;  %v603_v54 = vadd.f32 %v602_v52, %v601_v49 }
 0x10b   :  { %v604_v55 = vpop.f32.mrf.mxu0  ;;  %v625_v58 = vadd.f32 %v624_v53, %v623_v50 }
 0x10c   :  { %v626_v56 = vpop.f32.mrf.mxu1  ;;  %v367_v57 = vadd.f32 %v603_v54, %v543_v51 }
 0x10d   :  { %v605_v59 = vpop.f32.mrf.mxu0 }
 0x10e   :  { %v627_v60 = vpop.f32.mrf.mxu1  ;;  %v407_v61 = vadd.f32 %v625_v58, %v367_v57 }
 0x110   :  { %v412_v62 = vmax.f32 %v407_v61, 0.0 }
 0x112   :  { %v413_v63 = vpack.c.bf16 %v412_v62, %v412_v62 }
 0x114   :  { %655 = vmatmul.mubr.bf16.vlgmr.msra.gmra.mxu0 %v413_v63 }
 0x1d4   :  { %v519_v1 = vpop.f32.mrf.mxu0 }
 0x1d5   :  { %v520_v2 = vadd.f32 %v576_v0, %v519_v1 }
 0x1d6   :  { %v656_v3 = vpop.f32.mrf.mxu0 }
 0x1d7   :  { %v525_v4 = vpack.c.bf16 %v520_v2, %v520_v2 }
 0x1d8   :  { %v522_v5 = vpop.f32.mrf.mxu0 }
 0x1d9   :  { %526 = vst [vmem:[#allocation8] sm:$0xf] %v525_v4 }
 0x1da   :  { %v657_v6 = vpop.f32.mrf.mxu0 }
 0x1db   :  { %777 = shalt.err (!%p774_p5)
}
 0x1dc   :  { %536 = dma.vmem_to_hbm [thread:$0]  %s534_s2, 64, %s853_s5, [#allocation4]  }
 0x1dd   :  { %790 = dma.done.wait [#allocation4], 64  }
 0x1de   :  { %791 = vsyncadd [#allocation4], 4294967232 }
 0x1df   :  { %540 = vsyncpa [#allocation3], 1 }
 0x1e0   :  { %541 = vsyncpa [#allocation6], 1 }
 0x1e1   :  { %542 = vsyncpa [#allocation4], 1 }

</bundles_post_ra>
